<compile_context>
chip_gen: v7x
topology: tpu7x:2x2x1
jax: 0.10.0
libtpu: 0.0.40
codegen_flags: <defaults>
</compile_context>

<pallas_src>
import math

import jax
import jax.numpy as jnp
from jax import lax
from jax.experimental import pallas as pl
from jax.experimental.pallas import tpu as pltpu

SQRT2 = math.sqrt(2.0)
LAMBDA_WI = 0.5
C_SIDE = math.exp(-LAMBDA_WI * SQRT2)   # taps at column offsets -1 / +1
C_MID = math.exp(-LAMBDA_WI * 1.0)      # taps at column offset 0


def _upsample_rows_kernel(gmin_ref, xm_ref, xh_ref, o_ref):
    """One (batch, row-tile) grid step.

    gmin_ref: SMEM f32[1]        global min of the unfolded windows (== min(min(x), 0))
    xm_ref:   VMEM (1, TR, W)    input rows of this tile
    xh_ref:   VMEM (1, HR, W)    halo block; row 0 is input row (t+1)*TR (first row of
                                 the next tile), only needed for the seam pixel row
    o_ref:    VMEM (1, TR, 2W)   fused output: [:, :W] even rows (copy of x),
                                 [:, W:] odd rows (interpolated / last-row duplicate)
    """
    gmin = gmin_ref[0]
    x = xm_ref[0]                 # (TR, W)
    x_halo = xh_ref[0, 0:1, :]    # (1, W)
    tr, w = x.shape

    def tap_fields(a):
        # Per-element sums over the 3 column taps of the (2,3) unfold window row:
        #   wsum[r, j]  = sum_{dj in -1,0,+1} coef(dj) * e[r, j+dj]
        #   vwsum[r, j] = sum_{dj}            coef(dj) * e[r, j+dj] * a[r, j+dj]
        # with zero fill outside [0, W)  (F.unfold zero padding: value 0 -> weight 0).
        r, wd = a.shape
        nz = (a != 0.0).astype(jnp.float32)
        # Hoisted weight field, ONE EUP op per element:
        #   2/(1+exp(z)) == 1 - tanh(z/2)   (exact; z = a - gmin >= 0)
        e = (1.0 - jnp.tanh(0.5 * (a - gmin))) * nz
        ae = a * e
        if wd % 128 == 0 and r >= 8:
            # Lane-aligned fast path: XLU rolls (free slot, no materialized copies),
            # edge lanes zeroed to reproduce the unfold zero padding.
            col = lax.broadcasted_iota(jnp.int32, (r, wd), 1)
            has_l = col > 0
            has_r = col < wd - 1
            e_l = jnp.where(has_l, pltpu.roll(e, 1, axis=1), 0.0)
            ae_l = jnp.where(has_l, pltpu.roll(ae, 1, axis=1), 0.0)
            e_r = jnp.where(has_r, pltpu.roll(e, wd - 1, axis=1), 0.0)
            ae_r = jnp.where(has_r, pltpu.roll(ae, wd - 1, axis=1), 0.0)
        else:
            # Safe fallback for non-lane-aligned widths / tiny (halo) rows.
            zc = jnp.zeros((r, 1), jnp.float32)
            e_l = jnp.concatenate([zc, e[:, : wd - 1]], axis=1)
            ae_l = jnp.concatenate([zc, ae[:, : wd - 1]], axis=1)
            e_r = jnp.concatenate([e[:, 1:], zc], axis=1)
            ae_r = jnp.concatenate([ae[:, 1:], zc], axis=1)
        wsum = C_MID * e + C_SIDE * (e_l + e_r)
        vwsum = C_MID * ae + C_SIDE * (ae_l + ae_r)
        return wsum, vwsum

    w_m, vw_m = tap_fields(x)        # (TR, W)
    w_h, vw_h = tap_fields(x_halo)   # (1, W)

    # "Next row" fields for every row of the tile: row r pairs with row r+1; the tile's
    # last row pairs with the halo row (first row of the next tile).
    row = lax.broadcasted_iota(jnp.int32, (tr, w), 0)
    last_row = row == tr - 1
    if tr % 8 == 0 and w % 128 == 0:
        # sublane roll (XLU) + halo patch -> no sublane-misaligned partial stores later
        w_next = jnp.where(last_row, w_h, pltpu.roll(w_m, tr - 1, axis=0))
        vw_next = jnp.where(last_row, vw_h, pltpu.roll(vw_m, tr - 1, axis=0))
    else:
        w_next = jnp.concatenate([w_m[1:], w_h], axis=0)
        vw_next = jnp.concatenate([vw_m[1:], vw_h], axis=0)

    den = w_m + w_next
    num = vw_m + vw_next
    pix = num / jnp.where(den == 0.0, 1.0, den)          # (TR, W)

    # The global last output row duplicates x[H-1] instead of interpolating
    # (torch.dstack((result[:, :, :-1], x[:, :, -1:])) in the reference).
    is_last_tile = pl.program_id(1) == pl.num_programs(1) - 1
    odd = jnp.where(jnp.logical_and(is_last_tile, last_row), x, pix)

    # Fused interleaved output block: columns [0, W) = even rows, [W, 2W) = odd rows.
    # Two full-tile stores (lane-aligned when W % 128 == 0).
    o_ref[0, :, 0:w] = x
    o_ref[0, :, w:2 * w] = odd


def _pick_row_tile(h, w, n):
    """Largest multiple-of-8 row tile that divides H and fits a ~24 MiB VMEM budget,
    while keeping at least 2 total grid steps when possible (v7x has 2 TensorCores)."""
    budget_bytes = 24 * 1024 * 1024
    # Per-row VMEM: f32 in (W) + out (2W), double-buffered, plus ~12 full-tile f32
    # temporaries inside the kernel.  The halo block (2 x 8 x W x 4B) is per TILE,
    # not per row, so it is excluded here (it is tiny relative to the budget).
    bytes_per_row = 2 * 4 * (w + 2 * w) + 12 * 4 * w
    max_rows = max(8, budget_bytes // max(bytes_per_row, 1))
    if n == 1:
        # Guarantee >= 2 grid steps for megacore when the batch axis can't provide them.
        max_rows = min(max_rows, max(8, h // 2))
    best = None
    for cand in range(8, min(h, max_rows) + 1, 8):
        if h % cand == 0:
            best = cand
    if best is not None:
        return best
    # TODO(synk): H with no multiple-of-8 divisor under the budget falls back to a
    # single whole-image tile; extremely large such images could exceed the VMEM limit
    # (a ragged last-tile path would be needed to cover that case).
    return h


def upsampling_conv_forward(x, *, row_tile=None):
    """Forward pass of Upsampling_Conv(upsampling_factor=2, n_channels=1).

    x: (N, 1, H, W) float32  ->  (N, 1, 2*H, W) float32
    """
    x = x.astype(jnp.float32)
    n, c, h, w = x.shape
    if c != 1:
        # TODO(synk): n_channels > 1 path not implemented (F.unfold would mix channels
        # into 6*C-tap windows); the module default is n_channels=1.
        raise NotImplementedError("only n_channels=1 is supported")
    if h < 2:
        raise ValueError("need at least 2 rows to interpolate")

    x3 = x[:, 0, :, :]                                    # (N, H, W)
    # torch.min over the unfolded windows: every x element appears in some window and
    # the unfold zero-padding contributes 0, so the global min is min(min(x), 0).
    gmin = jnp.minimum(jnp.min(x3), 0.0).reshape(1)

    tr = row_tile if row_tile is not None else _pick_row_tile(h, w, n)
    if h % tr != 0 or not (tr == h or tr % 8 == 0) or tr < 2:
        raise ValueError(f"invalid row_tile={tr} for H={h}")
    nt = h // tr

    # Halo block: the 8-row group whose first row is input row (t+1)*TR (clamped in
    # range); only its first row is consumed, and it is ignored on the last tile.
    halo_rows = 8 if tr % 8 == 0 else tr
    step = tr // halo_rows
    n_halo_blocks = -(-h // halo_rows)

    out = pl.pallas_call(
        _upsample_rows_kernel,
        out_shape=jax.ShapeDtypeStruct((n, h, 2 * w), jnp.float32),
        grid=(n, nt),
        in_specs=[
            pl.BlockSpec(memory_space=pltpu.MemorySpace.SMEM),          # gmin scalar
            pl.BlockSpec((1, tr, w), lambda b, t: (b, t, 0)),           # main rows
            pl.BlockSpec(                                               # halo rows
                (1, halo_rows, w),
                lambda b, t: (b, jnp.minimum((t + 1) * step, n_halo_blocks - 1), 0)),
        ],
        out_specs=pl.BlockSpec((1, tr, 2 * w), lambda b, t: (b, t, 0)),
        compiler_params=pltpu.CompilerParams(
            dimension_semantics=("parallel", "parallel"),
            vmem_limit_bytes=40 * 1024 * 1024),
    )(gmin, x3, x3)

    # (N, H, 2W) row-major is exactly the interleaved (N, 2H, W): free reshape.
    return out.reshape(n, 1, 2 * h, w)


def _reference_forward(x):
    """Pure-JAX reference mirroring the PyTorch code (for verification)."""
    x = x.astype(jnp.float32)
    n, c, h, w = x.shape
    xp = jnp.pad(x[:, 0], ((0, 0), (0, 0), (1, 1)))
    top, bot = xp[:, :-1, :], xp[:, 1:, :]
    win = jnp.stack(
        [top[:, :, 0:w], top[:, :, 1:w + 1], top[:, :, 2:w + 2],
         bot[:, :, 0:w], bot[:, :, 1:w + 1], bot[:, :, 2:w + 2]], axis=-1)
    dist = jnp.array([SQRT2, 1.0, SQRT2, SQRT2, 1.0, SQRT2], jnp.float32)
    gmin = jnp.min(win)
    wi = jnp.exp(-LAMBDA_WI * dist) * (2.0 / (1.0 + jnp.exp(win - gmin))) \
        * (win != 0.0).astype(jnp.float32)
    num = (win * wi).sum(-1)
    den = wi.sum(-1)
    den = jnp.where(den == 0.0, 1.0, den)
    pix = num / den                                       # (N, H-1, W)
    result = jnp.zeros((n, 1, 2 * h, w), jnp.float32)
    result = result.at[:, :, jnp.arange(0, 2 * h, 2), :].set(x)
    result = result.at[:, :, jnp.arange(1, 2 * h - 1, 2), :].set(pix[:, None])
    return jnp.concatenate([result[:, :, :-1, :], x[:, :, -1:, :]], axis=2)


if __name__ == "__main__":
    key = jax.random.PRNGKey(0)
    k1, k2, k3 = jax.random.split(key, 3)

    # Tolerance note: the kernel's 1 - tanh(z/2) weight is an EXACT rewrite of the
    # reference's 2/(1+exp(z)); the residual difference is only the hardware tanh vs
    # exp approximation delta (~1e-7 absolute), which can amplify to ~1e-5..1e-4 in
    # windows where every tap is far from the global min (all weights << 1).  Any true
    # semantic error (wrong tap / shift direction / row pairing) would be >> 1e-2.
    RTOL, ATOL = 1e-5, 1e-4

    # Case 1: lane-aligned W, auto tile, batch axis provides the grid parallelism.
    x1 = jax.random.normal(k1, (2, 1, 16, 128), dtype=jnp.float32)
    out1 = jax.block_until_ready(jax.jit(upsampling_conv_forward)(x1))
    ref1 = _reference_forward(x1)
    assert out1.shape == (2, 1, 32, 128)
    assert out1.dtype == jnp.float32
    assert jnp.allclose(out1, ref1, rtol=RTOL, atol=ATOL)

    # Case 2: multiple row tiles (halo / seam / last-tile / sublane-roll paths) and a
    # zero block (exercises the value==0 -> weight 0 rule and the den==0 guard).
    x2 = jax.random.normal(k2, (1, 1, 32, 128), dtype=jnp.float32)
    x2 = x2.at[:, :, 8:12, :].set(0.0)
    out2 = jax.block_until_ready(
        jax.jit(lambda a: upsampling_conv_forward(a, row_tile=8))(x2))
    ref2 = _reference_forward(x2)
    assert out2.shape == (1, 1, 64, 128)
    assert out2.dtype == jnp.float32
    assert jnp.allclose(out2, ref2, rtol=RTOL, atol=ATOL)

    # Case 3: small, non-lane-aligned W -> exercises the concat fallback paths.
    x3 = jax.random.normal(k3, (2, 1, 16, 16), dtype=jnp.float32)
    out3 = jax.block_until_ready(jax.jit(upsampling_conv_forward)(x3))
    ref3 = _reference_forward(x3)
    assert out3.shape == (2, 1, 32, 16)
    assert out3.dtype == jnp.float32
    assert jnp.allclose(out3, ref3, rtol=RTOL, atol=ATOL)

    print("KERNEL_OK")
</pallas_src>

<mosaic_0001>
module attributes {stable_mosaic.version = 11 : i64} {
  func.func @_upsample_rows_kernel(%arg0: i32, %arg1: i32, %arg2: memref<1xf32, #tpu.memory_space<smem>>, %arg3: memref<1x16x128xf32, #tpu.memory_space<vmem>>, %arg4: memref<1x8x128xf32, #tpu.memory_space<vmem>>, %arg5: memref<1x16x256xf32, #tpu.memory_space<vmem>>) attributes {dimension_semantics = [#tpu.dimension_semantics<parallel>, #tpu.dimension_semantics<parallel>], iteration_bounds = array<i64: 2, 1>, scalar_prefetch = 0 : i64, scratch_operands = 0 : i64, tpu.core_type = #tpu.core_type<tc>, window_params = [{transform_indices = @transform_0, window_bounds = array<i64: 1>}, {transform_indices = @transform_1, window_bounds = array<i64: 1, 16, 128>}, {transform_indices = @transform_2, window_bounds = array<i64: 1, 8, 128>}, {transform_indices = @transform_3, window_bounds = array<i64: 1, 16, 256>}]} {
    %c0 = arith.constant 0 : index
    %0 = memref.load %arg2[%c0] : memref<1xf32, #tpu.memory_space<smem>>
    %c0_0 = arith.constant 0 : index
    %c0_1 = arith.constant 0 : index
    %c0_2 = arith.constant 0 : index
    %1 = vector.load %arg3[%c0_0, %c0_1, %c0_2] : memref<1x16x128xf32, #tpu.memory_space<vmem>>, vector<1x16x128xf32>
    %2 = vector.shape_cast %1 : vector<1x16x128xf32> to vector<16x128xf32>
    %c0_3 = arith.constant 0 : index
    %c0_4 = arith.constant 0 : index
    %c0_5 = arith.constant 0 : index
    %3 = vector.load %arg4[%c0_3, %c0_4, %c0_5] : memref<1x8x128xf32, #tpu.memory_space<vmem>>, vector<1x1x128xf32>
    %4 = vector.shape_cast %3 : vector<1x1x128xf32> to vector<1x128xf32>
    %cst = arith.constant 0.000000e+00 : f32
    %5 = vector.broadcast %cst : f32 to vector<16x128xf32>
    %6 = arith.cmpf one, %2, %5 : vector<16x128xf32>
    %7 = arith.extui %6 : vector<16x128xi1> to vector<16x128xi32>
    %8 = arith.sitofp %7 : vector<16x128xi32> to vector<16x128xf32>
    %9 = vector.broadcast %0 : f32 to vector<16x128xf32>
    %10 = arith.subf %2, %9 : vector<16x128xf32>
    %cst_6 = arith.constant 5.000000e-01 : f32
    %11 = vector.broadcast %cst_6 : f32 to vector<16x128xf32>
    %12 = arith.mulf %11, %10 : vector<16x128xf32>
    %13 = math.tanh %12 : vector<16x128xf32>
    %cst_7 = arith.constant 1.000000e+00 : f32
    %14 = vector.broadcast %cst_7 : f32 to vector<16x128xf32>
    %15 = arith.subf %14, %13 : vector<16x128xf32>
    %16 = arith.mulf %15, %8 : vector<16x128xf32>
    %17 = arith.mulf %2, %16 : vector<16x128xf32>
    %18 = tpu.iota {dimensions = array<i32: 1>} : vector<16x128xi32>
    %c0_i32 = arith.constant 0 : i32
    %19 = vector.broadcast %c0_i32 : i32 to vector<16x128xi32>
    %20 = arith.cmpi sgt, %18, %19 : vector<16x128xi32>
    %c127_i32 = arith.constant 127 : i32
    %21 = vector.broadcast %c127_i32 : i32 to vector<16x128xi32>
    %22 = arith.cmpi slt, %18, %21 : vector<16x128xi32>
    %c1_i32 = arith.constant 1 : i32
    %23 = tpu.dynamic_rotate %16 by %c1_i32 dim 1 : vector<16x128xf32>, i32 -> vector<16x128xf32>
    %cst_8 = arith.constant 0.000000e+00 : f32
    %24 = vector.broadcast %cst_8 : f32 to vector<16x128xf32>
    %25 = arith.select %20, %23, %24 : vector<16x128xi1>, vector<16x128xf32>
    %c1_i32_9 = arith.constant 1 : i32
    %26 = tpu.dynamic_rotate %17 by %c1_i32_9 dim 1 : vector<16x128xf32>, i32 -> vector<16x128xf32>
    %cst_10 = arith.constant 0.000000e+00 : f32
    %27 = vector.broadcast %cst_10 : f32 to vector<16x128xf32>
    %28 = arith.select %20, %26, %27 : vector<16x128xi1>, vector<16x128xf32>
    %c127_i32_11 = arith.constant 127 : i32
    %29 = tpu.dynamic_rotate %16 by %c127_i32_11 dim 1 : vector<16x128xf32>, i32 -> vector<16x128xf32>
    %cst_12 = arith.constant 0.000000e+00 : f32
    %30 = vector.broadcast %cst_12 : f32 to vector<16x128xf32>
    %31 = arith.select %22, %29, %30 : vector<16x128xi1>, vector<16x128xf32>
    %c127_i32_13 = arith.constant 127 : i32
    %32 = tpu.dynamic_rotate %17 by %c127_i32_13 dim 1 : vector<16x128xf32>, i32 -> vector<16x128xf32>
    %cst_14 = arith.constant 0.000000e+00 : f32
    %33 = vector.broadcast %cst_14 : f32 to vector<16x128xf32>
    %34 = arith.select %22, %32, %33 : vector<16x128xi1>, vector<16x128xf32>
    %cst_15 = arith.constant 0.606530666 : f32
    %35 = vector.broadcast %cst_15 : f32 to vector<16x128xf32>
    %36 = arith.mulf %35, %16 : vector<16x128xf32>
    %37 = arith.addf %25, %31 : vector<16x128xf32>
    %cst_16 = arith.constant 0.493068695 : f32
    %38 = vector.broadcast %cst_16 : f32 to vector<16x128xf32>
    %39 = arith.mulf %38, %37 : vector<16x128xf32>
    %40 = arith.addf %36, %39 : vector<16x128xf32>
    %cst_17 = arith.constant 0.606530666 : f32
    %41 = vector.broadcast %cst_17 : f32 to vector<16x128xf32>
    %42 = arith.mulf %41, %17 : vector<16x128xf32>
    %43 = arith.addf %28, %34 : vector<16x128xf32>
    %cst_18 = arith.constant 0.493068695 : f32
    %44 = vector.broadcast %cst_18 : f32 to vector<16x128xf32>
    %45 = arith.mulf %44, %43 : vector<16x128xf32>
    %46 = arith.addf %42, %45 : vector<16x128xf32>
    %cst_19 = arith.constant 0.000000e+00 : f32
    %47 = vector.broadcast %cst_19 : f32 to vector<1x128xf32>
    %48 = arith.cmpf one, %4, %47 : vector<1x128xf32>
    %49 = arith.extui %48 : vector<1x128xi1> to vector<1x128xi32>
    %50 = arith.sitofp %49 : vector<1x128xi32> to vector<1x128xf32>
    %51 = vector.broadcast %0 : f32 to vector<1x128xf32>
    %52 = arith.subf %4, %51 : vector<1x128xf32>
    %cst_20 = arith.constant 5.000000e-01 : f32
    %53 = vector.broadcast %cst_20 : f32 to vector<1x128xf32>
    %54 = arith.mulf %53, %52 : vector<1x128xf32>
    %55 = math.tanh %54 : vector<1x128xf32>
    %cst_21 = arith.constant 1.000000e+00 : f32
    %56 = vector.broadcast %cst_21 : f32 to vector<1x128xf32>
    %57 = arith.subf %56, %55 : vector<1x128xf32>
    %58 = arith.mulf %57, %50 : vector<1x128xf32>
    %59 = arith.mulf %4, %58 : vector<1x128xf32>
    %cst_22 = arith.constant 0.000000e+00 : f32
    %60 = vector.broadcast %cst_22 : f32 to vector<1x1xf32>
    %61 = vector.extract_strided_slice %58 {offsets = [0, 0], sizes = [1, 127], strides = [1, 1]} : vector<1x128xf32> to vector<1x127xf32>
    %62 = tpu.concatenate %60, %61 in 1 : vector<1x1xf32>, vector<1x127xf32> -> vector<1x128xf32>
    %63 = vector.extract_strided_slice %59 {offsets = [0, 0], sizes = [1, 127], strides = [1, 1]} : vector<1x128xf32> to vector<1x127xf32>
    %64 = tpu.concatenate %60, %63 in 1 : vector<1x1xf32>, vector<1x127xf32> -> vector<1x128xf32>
    %65 = vector.extract_strided_slice %58 {offsets = [0, 1], sizes = [1, 127], strides = [1, 1]} : vector<1x128xf32> to vector<1x127xf32>
    %66 = tpu.concatenate %65, %60 in 1 : vector<1x127xf32>, vector<1x1xf32> -> vector<1x128xf32>
    %67 = vector.extract_strided_slice %59 {offsets = [0, 1], sizes = [1, 127], strides = [1, 1]} : vector<1x128xf32> to vector<1x127xf32>
    %68 = tpu.concatenate %67, %60 in 1 : vector<1x127xf32>, vector<1x1xf32> -> vector<1x128xf32>
    %cst_23 = arith.constant 0.606530666 : f32
    %69 = vector.broadcast %cst_23 : f32 to vector<1x128xf32>
    %70 = arith.mulf %69, %58 : vector<1x128xf32>
    %71 = arith.addf %62, %66 : vector<1x128xf32>
    %cst_24 = arith.constant 0.493068695 : f32
    %72 = vector.broadcast %cst_24 : f32 to vector<1x128xf32>
    %73 = arith.mulf %72, %71 : vector<1x128xf32>
    %74 = arith.addf %70, %73 : vector<1x128xf32>
    %cst_25 = arith.constant 0.606530666 : f32
    %75 = vector.broadcast %cst_25 : f32 to vector<1x128xf32>
    %76 = arith.mulf %75, %59 : vector<1x128xf32>
    %77 = arith.addf %64, %68 : vector<1x128xf32>
    %cst_26 = arith.constant 0.493068695 : f32
    %78 = vector.broadcast %cst_26 : f32 to vector<1x128xf32>
    %79 = arith.mulf %78, %77 : vector<1x128xf32>
    %80 = arith.addf %76, %79 : vector<1x128xf32>
    %81 = tpu.iota {dimensions = array<i32: 0>} : vector<16x128xi32>
    %c15_i32 = arith.constant 15 : i32
    %82 = vector.broadcast %c15_i32 : i32 to vector<16x128xi32>
    %83 = arith.cmpi eq, %81, %82 : vector<16x128xi32>
    %c15_i32_27 = arith.constant 15 : i32
    %84 = tpu.dynamic_rotate %40 by %c15_i32_27 dim 0 : vector<16x128xf32>, i32 -> vector<16x128xf32>
    %85 = vector.shape_cast %74 : vector<1x128xf32> to vector<1x128xf32>
    %86 = vector.broadcast %85 : vector<1x128xf32> to vector<16x128xf32>
    %87 = arith.select %83, %86, %84 : vector<16x128xi1>, vector<16x128xf32>
    %c15_i32_28 = arith.constant 15 : i32
    %88 = tpu.dynamic_rotate %46 by %c15_i32_28 dim 0 : vector<16x128xf32>, i32 -> vector<16x128xf32>
    %89 = vector.shape_cast %80 : vector<1x128xf32> to vector<1x128xf32>
    %90 = vector.broadcast %89 : vector<1x128xf32> to vector<16x128xf32>
    %91 = arith.select %83, %90, %88 : vector<16x128xi1>, vector<16x128xf32>
    %92 = arith.addf %40, %87 : vector<16x128xf32>
    %93 = arith.addf %46, %91 : vector<16x128xf32>
    %cst_29 = arith.constant 0.000000e+00 : f32
    %94 = vector.broadcast %cst_29 : f32 to vector<16x128xf32>
    %95 = arith.cmpf oeq, %92, %94 : vector<16x128xf32>
    %cst_30 = arith.constant 1.000000e+00 : f32
    %96 = vector.broadcast %cst_30 : f32 to vector<16x128xf32>
    %97 = arith.select %95, %96, %92 : vector<16x128xi1>, vector<16x128xf32>
    %98 = arith.divf %93, %97 : vector<16x128xf32>
    %c0_i32_31 = arith.constant 0 : i32
    %99 = arith.cmpi eq, %arg1, %c0_i32_31 : i32
    %100 = vector.broadcast %99 : i1 to vector<16x128xi1>
    %101 = arith.andi %100, %83 : vector<16x128xi1>
    %102 = arith.select %101, %2, %98 : vector<16x128xi1>, vector<16x128xf32>
    %c0_32 = arith.constant 0 : index
    %c0_33 = arith.constant 0 : index
    %c0_34 = arith.constant 0 : index
    %103 = vector.load %arg5[%c0_32, %c0_33, %c0_34] : memref<1x16x256xf32, #tpu.memory_space<vmem>>, vector<1x16x128xf32>
    %104 = vector.shape_cast %103 : vector<1x16x128xf32> to vector<16x128xf32>
    %105 = vector.shape_cast %2 : vector<16x128xf32> to vector<1x16x128xf32>
    tpu.vector_store %arg5[%c0_32, %c0_33, %c0_34], %105 {strides = array<i32>} : memref<1x16x256xf32, #tpu.memory_space<vmem>>, vector<1x16x128xf32>,
    %c0_35 = arith.constant 0 : index
    %c0_36 = arith.constant 0 : index
    %c128 = arith.constant 128 : index
    %106 = vector.load %arg5[%c0_35, %c0_36, %c128] : memref<1x16x256xf32, #tpu.memory_space<vmem>>, vector<1x16x128xf32>
    %107 = vector.shape_cast %106 : vector<1x16x128xf32> to vector<16x128xf32>
    %108 = vector.shape_cast %102 : vector<16x128xf32> to vector<1x16x128xf32>
    tpu.vector_store %arg5[%c0_35, %c0_36, %c128], %108 {strides = array<i32>} : memref<1x16x256xf32, #tpu.memory_space<vmem>>, vector<1x16x128xf32>,
    return
  }
  func.func @transform_0(%arg0: i32, %arg1: i32) -> i32 {
    %c0_i32 = arith.constant 0 : i32
    %c0_i32_0 = arith.constant 0 : i32
    return %c0_i32 : i32
  }
  func.func @transform_1(%arg0: i32, %arg1: i32) -> (i32, i32, i32) {
    %c0_i32 = arith.constant 0 : i32
    %c0_i32_0 = arith.constant 0 : i32
    return %arg0, %arg1, %c0_i32 : i32, i32, i32
  }
  func.func @transform_2(%arg0: i32, %arg1: i32) -> (i32, i32, i32) {
    %c1_i32 = arith.constant 1 : i32
    %0 = arith.addi %arg1, %c1_i32 : i32
    %c2_i32 = arith.constant 2 : i32
    %1 = arith.muli %0, %c2_i32 : i32
    %c1_i32_0 = arith.constant 1 : i32
    %2 = arith.minsi %1, %c1_i32_0 : i32
    %c0_i32 = arith.constant 0 : i32
    %c0_i32_1 = arith.constant 0 : i32
    return %arg0, %2, %c0_i32 : i32, i32, i32
  }
  func.func @transform_3(%arg0: i32, %arg1: i32) -> (i32, i32, i32) {
    %c0_i32 = arith.constant 0 : i32
    %c0_i32_0 = arith.constant 0 : i32
    return %arg0, %arg1, %c0_i32 : i32, i32, i32
  }
}

</mosaic_0001>

<bundles_post_ra>
// kernel: upsampling_conv_forward.1
= control target key start
LH: loop header
LB: loop body
LE: loop exit
PB: predicated region body
PF: predicated region fallthrough
CT: control target
= control target key end

     0   :  { %s645_s14 = smov 0   ;;  %s647_s15 = smov 0   ;;  %s722_s0 = inlined_call_operand.<no memory space> [shape: f32[1], index: 0, kind: input, shape index: {}]   ;;  %s723_s1 = inlined_call_operand.vmem [shape: f32[2,16,128], index: 1, kind: input, shape index: {}, may-alias: {1,2}]   ;;  %s724_s2 = inlined_call_operand.vmem [shape: f32[2,16,128], index: 2, kind: input, shape index: {}, may-alias: {1,2}]   ;;  %s725_s3 = inlined_call_operand.vmem [shape: f32[2,16,256], index: 3, kind: output, shape index: {}]  }
   0x1   :  { %8 = sst [smem:[#allocation2]] %s722_s0  ;;  %s649_s16 = smov 0  }
   0x2 LB: > { %s26_s0 = sadd.s32 1, %s613_s15  ;;  %p541_p0 = scmp.ge.s32.totalorder %s617_s16, 1  ;;  %s617_s16 = sphi %s649_s16, %s14_s16   ;;  %s613_s15 = sphi %s647_s15, %s727_s15   ;;  %s609_s14 = sphi %s645_s14, %s726_s14  }
   0x3   : > { %p28_p1 = scmp.ge.s32.totalorder %s26_s0, 2  ;;  %p190_p2 = scmp.lt.s32.totalorder %s617_s16, 3 }
   0x5   : > { %s729_s0 = smov (%p28_p1, %s26_s0), 0  ;;  %p191_p3 = pnand %p541_p0, %p190_p2 }
   0x6   : > { %p236_p4 = scmp.lt.s32.totalorder (!%p191_p3), %s609_s14, 1  ;;  %s272_s17 = sld [smem:[#allocation2]] (!%p191_p3)  ;;  %v619_v11 = vmov (!%p191_p3), 0.0   ;;  %v295_v26 = vlaneseq (!%p191_p3)  ;;  %vm362_vm5 = vcmask (!%p191_p3), 1039360   ;;  %vm352_vm6 = vcmask (!%p191_p3), 7168  }
   0x7   : > { %194 = sbr.rel (%p191_p3) target bundleno = 189 (0xbd), region = 32  ;;  %s620_s26 = smov (!%p191_p3), 127  }
   0x8   : > { %s621_s27 = smov (!%p191_p3), 1   ;;  %v296_v27 = vand.u32 (!%p191_p3), 127, %v295_v26  ;;  %v377_v41 = vshrl.u32 (!%p191_p3), %v295_v26, 7 }
   0xa   : > { %vm298_vm3 = vcmp.lt.s32.totalorder (!%p191_p3), %v296_v27, 127  ;;  %vm297_vm4 = vcmp.gt.s32.totalorder (!%p191_p3), %v296_v27, 0  ;;  %vm383_vm7 = vcmp.lt.s32.totalorder (!%p191_p3), %v377_v41, 7  ;;  %v378_v51 = vadd.s32 (!%p191_p3), 8, %v377_v41 }
   0xb   : > { %v388_v54 = vsub.s32 (!%p191_p3), 0, %v377_v41 }
   0xc   : > { %v282_v2 = vstv (!%p191_p3), %s272_s17  ;;  %vm380_vm8 = vcmp.eq.s32.totalorder (!%p191_p3), %v378_v51, 15 }
   0xe   : > { %s731_s14 = smov (!%p236_p4, %s609_s14), 1 }
   0xf   : > { %s553_s18 = sshll.u32 %s731_s14, 4  ;;  %s556_s28 = sshll.u32 %s731_s14, 5 }
  0x10   : > { %s243_s21 = scalar_lea.vmem %s723_s1, %s553_s18  ;;  %s555_s22 = sadd.s32 8, %s553_s18 }
  0x11   : > { %v273_v0 = vld [vmem:[%s243_s21] sm:$0xff]  ;;  %v669_v1 = vld [vmem:[%s243_s21 + $0x8] sm:$0xff]  ;;  %s256_s25 = scalar_lea.vmem %s724_s2, %s555_s22  ;;  %s681_s4 = scalar_lea.vmem %s725_s3, %s556_s28 }
  0x12   : > { %v283_v3 = vsub.f32 %v273_v0, %v282_v2  ;;  %v284_v4 = vsub.f32 %v669_v1, %v282_v2  ;;  %v275_v5 = vld [vmem:[%s256_s25] sm:$0x1]  ;;  %vm276_vm0 = vcmp.ne.f32.partialorder %v273_v0, 0.0  ;;  %vm277_vm1 = vcmp.ne.f32.partialorder %v669_v1, 0.0  ;;  %422 = vst [vmem:[%s681_s4] sm:$0xff] %v273_v0  ;;  %423 = vst [vmem:[%s681_s4 + $0x10] sm:$0xff] %v669_v1 }
  0x13   : > { %v342_v6 = vsub.f32 %v275_v5, %v282_v2  ;;  %v548_v12 = vsel %vm276_vm0, 1.0, %v619_v11  ;;  %v549_v16 = vsel %vm277_vm1, 1.0, %v619_v11  ;;  %vm339_vm2 = vcmp.ne.f32.partialorder %v275_v5, 0.0 }
  0x14   : > { %v285_v7 = vmul.f32 0.5, %v283_v3  ;;  %v286_v8 = vmul.f32 0.5, %v284_v4  ;;  %v550_v21 = vsel %vm339_vm2, 1.0, %v619_v11 }
  0x15   : > { %v343_v9 = vmul.f32 0.5, %v342_v6 }
  0x16   : > { %585 = vtanh.f32 %v285_v7 }
  0x17   : > { %587 = vtanh.f32 %v286_v8 }
  0x18   : > { %589 = vtanh.f32 %v343_v9 }
  0x20   : > { %v586_v10 = vpop.eup %585 }
  0x21   : > { %v588_v13 = vpop.eup %587  ;;  %v289_v14 = vsub.f32 1.0, %v586_v10 }
  0x22   : > { %v590_v15 = vpop.eup %589  ;;  %v290_v17 = vsub.f32 1.0, %v588_v13 }
  0x23   : > { %v291_v18 = vmul.f32 %v548_v12, %v289_v14  ;;  %v345_v20 = vsub.f32 1.0, %v590_v15 }
  0x24   : > { %v292_v19 = vmul.f32 %v549_v16, %v290_v17 }
  0x25   : > { %311 = vrot.lane.b32.xlu1 %v291_v18, %s620_s26  ;;  %299 = vrot.lane.b32.xlu0 %v291_v18, %s621_s27  ;;  %v346_v22 = vmul.f32 %v550_v21, %v345_v20  ;;  %v293_v24 = vmul.f32 %v291_v18, %v273_v0  ;;  %v323_v33 = vmul.f32 0.60653067, %v291_v18 }
  0x26   : > { %v294_v23 = vmul.f32 %v292_v19, %v669_v1  ;;  %v324_v39 = vmul.f32 0.60653067, %v292_v19 }
  0x27   : > { %v686_v25 = vmul.f32 %v346_v22, %v275_v5  ;;  %v368_v49 = vmul.f32 0.60653067, %v346_v22  ;;  %v331_v4 = vmul.f32 0.60653067, %v293_v24 }
  0x28   : > { %v332_v0 = vmul.f32 0.60653067, %v294_v23 }
  0x29   : > { %313 = vrot.lane.b32.xlu1 %v292_v19, %s620_s26  ;;  %301 = vrot.lane.b32.xlu0 %v292_v19, %s621_s27  ;;  %v372_v18 = vmul.f32 0.60653067, %v686_v25 }
  0x2d   : > { %359 = vrot.lane.b32.xlu1 %v346_v22, %s620_s26  ;;  %349 = vrot.lane.b32.xlu0 %v346_v22, %s621_s27 }
  0x31   : > { %307 = vrot.lane.b32.xlu1 %v294_v23, %s621_s27  ;;  %305 = vrot.lane.b32.xlu0 %v293_v24, %s621_s27 }
  0x35   : > { %319 = vrot.lane.b32.xlu1 %v294_v23, %s620_s26  ;;  %317 = vrot.lane.b32.xlu0 %v293_v24, %s620_s26 }
  0x39   : > { %364 = vrot.lane.b32.xlu1 %v686_v25, %s620_s26  ;;  %355 = vrot.lane.b32.xlu0 %v686_v25, %s621_s27 }
  0x97   : > { %v312_v28 = vpop.permute.xlu1 %311  ;;  %v300_v29 = vpop.permute.xlu0 %299 }
  0x98   : > { %v315_v30 = vsel %vm298_vm3, %v312_v28, 0.0  ;;  %v303_v31 = vsel %vm297_vm4, %v300_v29, 0.0 }
  0x99   : > { %v325_v32 = vadd.f32 %v315_v30, %v303_v31 }
  0x9b   : > { %v327_v34 = vmul.f32 0.4930687, %v325_v32  ;;  %v314_v35 = vpop.permute.xlu1 %313  ;;  %v302_v36 = vpop.permute.xlu0 %301 }
  0x9c   : > { %v316_v37 = vsel %vm298_vm3, %v314_v35, 0.0  ;;  %v304_v38 = vsel %vm297_vm4, %v302_v36, 0.0 }
  0x9d   : > { %v326_v40 = vadd.f32 %v316_v37, %v304_v38  ;;  %v329_v42 = vadd.f32 %v327_v34, %v323_v33 }
  0x9f   : > { %v328_v43 = vmul.f32 0.4930687, %v326_v40  ;;  %v360_v44 = vpop.permute.xlu1 %359  ;;  %v350_v45 = vpop.permute.xlu0 %349  ;;  %v381_v52 = vrot.slane %v329_v42, 1 }
  0xa0   : > { %v363_v46 = vsel %vm362_vm5, %v360_v44, 0.0  ;;  %v353_v47 = vsel %vm352_vm6, 0.0, %v350_v45 }
  0xa1   : > { %v330_v48 = vadd.f32 %v328_v43, %v324_v39  ;;  %v369_v50 = vadd.f32 %v363_v46, %v353_v47 }
  0xa3   : > { %v382_v53 = vrot.slane %v330_v48, 1  ;;  %v370_v55 = vmul.f32 0.4930687, %v369_v50  ;;  %v308_v56 = vpop.permute.xlu1 %307  ;;  %v306_v57 = vpop.permute.xlu0 %305 }
  0xa4   : > { %v310_v63 = vsel %vm297_vm4, %v308_v56, 0.0  ;;  %v309_v5 = vsel %vm297_vm4, %v306_v57, 0.0 }
  0xa5   : > { %v384_v58 = vsel %vm383_vm7, %v381_v52, %v382_v53  ;;  %v385_v59 = vsel %vm383_vm7, %v382_v53, %v381_v52  ;;  %v371_v60 = vadd.f32 %v370_v55, %v368_v49 }
  0xa6   : > { %v402_v61 = vadd.f32 %v384_v58, %v329_v42 }
  0xa7   : > { %v389_v62 = vrot.slane %v371_v60, %v388_v54  ;;  %v320_v2 = vpop.permute.xlu1 %319  ;;  %v318_v3 = vpop.permute.xlu0 %317 }
  0xa8   : > { %vm406_vm9 = vcmp.eq.f32.partialorder %v402_v61, 0.0  ;;  %v322_v6 = vsel %vm298_vm3, %v320_v2, 0.0  ;;  %v321_v7 = vsel %vm298_vm3, %v318_v3, 0.0 }
  0xa9   : > { %v408_v8 = vsel %vm406_vm9, 1.0, %v402_v61  ;;  %v391_v9 = vsel %vm380_vm8, %v389_v62, %v385_v59  ;;  %v334_v10 = vadd.f32 %v322_v6, %v310_v63  ;;  %v333_v11 = vadd.f32 %v321_v7, %v309_v5 }
  0xaa   : > { %591 = vrcp.f32 %v408_v8  ;;  %v403_v12 = vadd.f32 %v391_v9, %v330_v48 }
  0xab   : > { %v336_v13 = vmul.f32 0.4930687, %v334_v10  ;;  %v335_v14 = vmul.f32 0.4930687, %v333_v11  ;;  %v365_v15 = vpop.permute.xlu1 %364  ;;  %v356_v16 = vpop.permute.xlu0 %355 }
  0xac   : > { %vm407_vm10 = vcmp.eq.f32.partialorder %v403_v12, 0.0  ;;  %v367_v17 = vsel %vm362_vm5, %v365_v15, 0.0  ;;  %v358_v19 = vsel %vm352_vm6, 0.0, %v356_v16 }
  0xad   : > { %v409_v20 = vsel %vm407_vm10, 1.0, %v403_v12  ;;  %v338_v21 = vadd.f32 %v336_v13, %v332_v0  ;;  %v337_v22 = vadd.f32 %v335_v14, %v331_v4  ;;  %v373_v23 = vadd.f32 %v367_v17, %v358_v19 }
  0xae   : > { %593 = vrcp.f32 %v409_v20 }
  0xaf   : > { %v393_v24 = vrot.slane %v338_v21, 1  ;;  %v392_v26 = vrot.slane %v337_v22, 1  ;;  %v374_v27 = vmul.f32 0.4930687, %v373_v23 }
  0xb1   : > { %v394_v28 = vsel %vm383_vm7, %v392_v26, %v393_v24  ;;  %v395_v29 = vsel %vm383_vm7, %v393_v24, %v392_v26  ;;  %v375_v30 = vadd.f32 %v374_v27, %v372_v18 }
  0xb2   : > { %v404_v31 = vadd.f32 %v394_v28, %v337_v22 }
  0xb3   : > { %v399_v32 = vrot.slane %v375_v30, %v388_v54 }
  0xb4   : > { %v592_v25 = vpop.eup %591 }
  0xb5   : > { %v411_v33 = vmul.f32 %v592_v25, %v404_v31  ;;  %v401_v34 = vsel %vm380_vm8, %v399_v32, %v395_v29 }
  0xb6   : > { %v405_v35 = vadd.f32 %v401_v34, %v338_v21 }
  0xb7   : > { %424 = vst [vmem:[%s681_s4 + $0x8] sm:$0xff] %v411_v33 }
  0xb8   : > { %v594_v36 = vpop.eup %593 }
  0xb9   : > { %v413_v37 = vmul.f32 %v594_v36, %v405_v35 }
  0xbb   : > { %v421_v38 = vsel %vm380_vm8, %v669_v1, %v413_v37 }
  0xbc   : > { %425 = vst [vmem:[%s681_s4 + $0x18] sm:$0xff] %v421_v38 }
  0xbd PF: > { %s14_s16 = sadd.s32 1, %s617_s16   ;;  %s726_s14 = smov %s613_s15 }
  0xbe   : > { %p11_p5 = scmp.ge.s32.totalorder %s14_s16, 4   ;;  %s727_s15 = smov %s729_s0 }
  0xc0   :  { %13 = sbr.rel (!%p11_p5) target bundleno = 2 (0x2), region = 65 }

</bundles_post_ra>
